<compile_context>
chip_gen: v7x
topology: tpu7x:2x2x1
jax: 0.10.0
libtpu: 0.0.40
codegen_flags: <defaults>
</compile_context>

<pallas_src>
import jax
import jax.numpy as jnp
from jax.experimental import pallas as pl
from jax.experimental.pallas import tpu as pltpu

D_MODEL = 768                 # hard-coded by nn.Conv2d(1, 64, (K, 768)) in the module
N_FILT = 64
KS = (1, 2, 3)
CONV_OUT = N_FILT * len(KS)   # 192
W_ALL_COLS = N_FILT * sum(KS)  # 64 * (1+2+3) = 384 fused filter columns


# ---------------------------------------------------------------------------
# Kernel 1: fused conv "code line" head (grid over batch blocks)
# ---------------------------------------------------------------------------
def conv_head_kernel(feat_ref, wall_ref, ball_ref, out_ref):
    bb, S, _ = feat_ref.shape
    F = N_FILT

    # Single fused MXU matmul for all six conv taps (bf16 in, f32 accumulate).
    x = feat_ref[...].reshape(bb * S, D_MODEL)                          # bf16 [bb*S, 768]
    y = jnp.dot(x, wall_ref[...], preferred_element_type=jnp.float32)   # f32  [bb*S, 384]
    y = y.reshape(bb, S, W_ALL_COLS)

    # K=1: columns [0:64]
    m1 = jnp.max(y[:, :, 0:F], axis=1)                                  # [bb, 64]
    # K=2: c[s] = tap0[s] + tap1[s+1]   (shift on the small 64-wide slices)
    c2 = y[:, :S - 1, F:2 * F] + y[:, 1:, 2 * F:3 * F]
    m2 = jnp.max(c2, axis=1)
    # K=3: c[s] = tap0[s] + tap1[s+1] + tap2[s+2]
    c3 = (y[:, :S - 2, 3 * F:4 * F]
          + y[:, 1:S - 1, 4 * F:5 * F]
          + y[:, 2:, 5 * F:6 * F])
    m3 = jnp.max(c3, axis=1)

    m = jnp.concatenate([m1, m2, m3], axis=1)                           # [bb, 192]
    # bias + ReLU hoisted past the max-pool (exact): relu(max_t c + b)
    out_ref[...] = jnp.maximum(m + ball_ref[...], 0.0)


def conv_head(hidden_bf16, w_all_bf16, b_all):
    B, S, _ = hidden_bf16.shape
    assert S >= max(KS)
    # Block several batch rows per grid step; keep out block shape legal
    # ((bb,192): bb == B or bb divisible by 8).
    bb = B if (B <= 8 or B % 8 != 0) else 8
    grid = (B // bb,)
    return pl.pallas_call(
        conv_head_kernel,
        out_shape=jax.ShapeDtypeStruct((B, CONV_OUT), jnp.float32),
        grid=grid,
        in_specs=[
            pl.BlockSpec((bb, S, D_MODEL), lambda i: (i, 0, 0)),
            pl.BlockSpec((D_MODEL, W_ALL_COLS), lambda i: (0, 0)),
            pl.BlockSpec((1, CONV_OUT), lambda i: (0, 0)),
        ],
        out_specs=pl.BlockSpec((bb, CONV_OUT), lambda i: (i, 0)),
        compiler_params=pltpu.CompilerParams(dimension_semantics=("parallel",)),
    )(hidden_bf16, w_all_bf16, b_all)


# ---------------------------------------------------------------------------
# Kernel 2: linear + 3-layer tanh RNN + out_proj + sigmoid (single call, no grid)
# ---------------------------------------------------------------------------
def classifier_tail_kernel(xconv_ref, manual_ref, wl_ref, bl_ref,
                           wih0_ref, wih12_ref, whh_ref, bih_ref, bhh_ref,
                           wout_ref, bout_ref, out_ref, pre0_ref, ys_ref):
    B = xconv_ref.shape[0]
    H = wl_ref.shape[1]

    # dropout is identity in eval mode
    lin = jnp.dot(xconv_ref[...], wl_ref[...],
                  preferred_element_type=jnp.float32) + bl_ref[...]      # [B, H]

    bih = bih_ref[...]
    bhh = bhh_ref[...]

    # Precompute the layer-0 input projection for ALL timesteps as one matmul.
    pre0_ref[...] = (jnp.dot(manual_ref[...], wih0_ref[...],
                             preferred_element_type=jnp.float32) + bih[0:1, :])

    whh0, whh1, whh2 = whh_ref[0], whh_ref[1], whh_ref[2]
    wih1, wih2 = wih12_ref[0], wih12_ref[1]
    b1, b2 = bih[1:2, :], bih[2:3, :]
    bh0, bh1, bh2 = bhh[0:1, :], bhh[1:2, :], bhh[2:3, :]

    # nn.RNN(feature_size, hidden, 3) with a 2-D input == unbatched sequence of
    # length B.  Sequential recurrence via fori_loop; h2 rows go to VMEM scratch.
    def step(t, carry):
        h0, h1, h2 = carry
        h0 = jnp.tanh(pre0_ref[pl.ds(t, 1), :]
                      + jnp.dot(h0, whh0, preferred_element_type=jnp.float32) + bh0)
        h1 = jnp.tanh(jnp.dot(h0, wih1, preferred_element_type=jnp.float32) + b1
                      + jnp.dot(h1, whh1, preferred_element_type=jnp.float32) + bh1)
        h2 = jnp.tanh(jnp.dot(h1, wih2, preferred_element_type=jnp.float32) + b2
                      + jnp.dot(h2, whh2, preferred_element_type=jnp.float32) + bh2)
        ys_ref[pl.ds(t, 1), :] = h2
        return (h0, h1, h2)

    zeros = jnp.zeros((1, H), jnp.float32)
    jax.lax.fori_loop(0, B, step, (zeros, zeros, zeros))

    y = jnp.tanh(ys_ref[...])                                            # torch.tanh(rnn_out)

    # out_proj on concat([lin, y]) — split the weight instead of a lane concat.
    wout = wout_ref[...]
    logits = (jnp.dot(lin, wout[:H, :], preferred_element_type=jnp.float32)
              + jnp.dot(y, wout[H:, :], preferred_element_type=jnp.float32)
              + bout_ref[...])                                           # [B, 1]
    out_ref[...] = jax.nn.sigmoid(logits)


def classifier_tail(xconv, manual, p):
    B = xconv.shape[0]
    H = p["wl"].shape[1]
    args = (xconv, manual, p["wl"], p["bl"], p["wih0"], p["wih12"],
            p["whh"], p["bih"], p["bhh"], p["wout"], p["bout"])
    vmem = lambda: pl.BlockSpec(memory_space=pltpu.MemorySpace.VMEM)
    return pl.pallas_call(
        classifier_tail_kernel,
        out_shape=jax.ShapeDtypeStruct((B, 1), jnp.float32),
        in_specs=[vmem() for _ in args],
        out_specs=vmem(),
        scratch_shapes=[pltpu.VMEM((B, H), jnp.float32),   # pre0
                        pltpu.VMEM((B, H), jnp.float32)],  # ys (rnn outputs)
    )(*args)


# ---------------------------------------------------------------------------
# Parameter init (deterministic, synthetic) + full forward
# ---------------------------------------------------------------------------
def init_params(key, hidden_size, feature_size, vocab_size):
    ks = jax.random.split(key, 16)
    p = {}
    p["emb"] = 0.05 * jax.random.normal(ks[0], (vocab_size, D_MODEL), jnp.float32)
    # Conv2d(1, 64, (K, 768)) weights, stored transposed as [K, 768, 64]
    for i, K in enumerate(KS):
        p[f"wc{K}"] = 0.02 * jax.random.normal(ks[1 + i], (K, D_MODEL, N_FILT), jnp.float32)
        p[f"bc{K}"] = 0.01 * jax.random.normal(ks[4 + i], (1, N_FILT), jnp.float32)
    H, F = hidden_size, feature_size
    # Linear(192, H)
    p["wl"] = 0.05 * jax.random.normal(ks[7], (CONV_OUT, H), jnp.float32)
    p["bl"] = 0.01 * jax.random.normal(ks[8], (1, H), jnp.float32)
    # nn.RNN(F, H, 3): W_ih_l0.T [F,H], W_ih_l{1,2}.T [H,H], W_hh_l{0,1,2}.T [H,H], biases [H]
    p["wih0"] = 0.1 * jax.random.normal(ks[9], (F, H), jnp.float32)
    p["wih12"] = 0.1 * jax.random.normal(ks[10], (2, H, H), jnp.float32)
    p["whh"] = 0.1 * jax.random.normal(ks[11], (3, H, H), jnp.float32)
    p["bih"] = 0.01 * jax.random.normal(ks[12], (3, H), jnp.float32)
    p["bhh"] = 0.01 * jax.random.normal(ks[13], (3, H), jnp.float32)
    # Linear(2H, 1)
    p["wout"] = 0.1 * jax.random.normal(ks[14], (2 * H, 1), jnp.float32)
    p["bout"] = 0.01 * jax.random.normal(ks[15], (1, 1), jnp.float32)
    return p


def model_forward(inputs_ids, attn_masks, manual_features, params):
    # --- encoder stand-in (plain JAX glue): outputs[0] = hidden states [B, S, 768]
    hidden = params["emb"][inputs_ids]
    del attn_masks  # only used by the dead mean-pooling block / the real encoder

    # Fuse the 6 conv taps into one [768, 384] weight (host-side, cheap), bf16 for MXU.
    w_all = jnp.concatenate([params["wc1"][0],
                             params["wc2"][0], params["wc2"][1],
                             params["wc3"][0], params["wc3"][1], params["wc3"][2]],
                            axis=1)                                               # [768, 384]
    b_all = jnp.concatenate([params["bc1"], params["bc2"], params["bc3"]], axis=1)  # [1, 192]

    xconv = conv_head(hidden.astype(jnp.bfloat16), w_all.astype(jnp.bfloat16), b_all)
    prob = classifier_tail(xconv, manual_features.astype(jnp.float32), params)
    return prob


# ---------------------------------------------------------------------------
# Pure-JAX reference (same math, same bf16 conv inputs) for a correctness check
# ---------------------------------------------------------------------------
def ref_forward(inputs_ids, manual, p, hidden_size):
    hidden = p["emb"][inputs_ids]
    hb = hidden.astype(jnp.bfloat16)
    B, S, _ = hidden.shape
    pooled = []
    for K in KS:
        L = S - K + 1
        c = sum(jnp.einsum("bld,dn->bln", hb[:, k:k + L, :],
                           p[f"wc{K}"][k].astype(jnp.bfloat16),
                           preferred_element_type=jnp.float32)
                for k in range(K))
        c = c + p[f"bc{K}"]
        pooled.append(jnp.max(jax.nn.relu(c), axis=1))
    x = jnp.concatenate(pooled, axis=1)
    lin = x @ p["wl"] + p["bl"]
    H = hidden_size
    h = [jnp.zeros((1, H), jnp.float32) for _ in range(3)]
    ys = []
    for t in range(B):
        inp = manual[t:t + 1, :].astype(jnp.float32)
        h[0] = jnp.tanh(inp @ p["wih0"] + p["bih"][0:1] + h[0] @ p["whh"][0] + p["bhh"][0:1])
        h[1] = jnp.tanh(h[0] @ p["wih12"][0] + p["bih"][1:2] + h[1] @ p["whh"][1] + p["bhh"][1:2])
        h[2] = jnp.tanh(h[1] @ p["wih12"][1] + p["bih"][2:3] + h[2] @ p["whh"][2] + p["bhh"][2:3])
        ys.append(h[2])
    y = jnp.tanh(jnp.concatenate(ys, axis=0))
    z = jnp.concatenate([lin, y], axis=-1)
    return jax.nn.sigmoid(z @ p["wout"] + p["bout"])


if __name__ == "__main__":
    B, S = 2, 16
    HIDDEN = 64          # config.hidden_size (kept small for the test)
    FEATS = 14           # config.feature_size (manual features)
    VOCAB = 50

    key = jax.random.PRNGKey(0)
    k_ids, k_man, k_params = jax.random.split(key, 3)

    inputs_ids = jax.random.randint(k_ids, (B, S), 0, VOCAB, dtype=jnp.int32)
    attn_masks = jnp.ones((B, S), dtype=jnp.int32)
    manual_features = jax.random.normal(k_man, (B, FEATS), jnp.float32)

    params = init_params(k_params, HIDDEN, FEATS, VOCAB)

    prob = model_forward(inputs_ids, attn_masks, manual_features, params)
    prob = jax.block_until_ready(prob)

    ref = ref_forward(inputs_ids, manual_features, params, HIDDEN)
    assert prob.shape == (B, 1)
    assert jnp.allclose(prob, ref, atol=1e-3, rtol=1e-3), (prob, ref)

    print("KERNEL_OK")
</pallas_src>

<mosaic_0001>
module attributes {stable_mosaic.version = 11 : i64} {
  func.func @conv_head_kernel(%arg0: i32, %arg1: memref<2x16x768xbf16, #tpu.memory_space<vmem>>, %arg2: memref<768x384xbf16, #tpu.memory_space<vmem>>, %arg3: memref<1x192xf32, #tpu.memory_space<vmem>>, %arg4: memref<2x192xf32, #tpu.memory_space<vmem>>) attributes {dimension_semantics = [#tpu.dimension_semantics<parallel>], iteration_bounds = array<i64: 1>, scalar_prefetch = 0 : i64, scratch_operands = 0 : i64, tpu.core_type = #tpu.core_type<tc>, window_params = [{transform_indices = @transform_0, window_bounds = array<i64: 2, 16, 768>}, {pipeline_mode = #tpu.pipeline_mode<synchronous>, transform_indices = @transform_1, window_bounds = array<i64: 768, 384>}, {pipeline_mode = #tpu.pipeline_mode<synchronous>, transform_indices = @transform_2, window_bounds = array<i64: 1, 192>}, {transform_indices = @transform_3, window_bounds = array<i64: 2, 192>}]} {
    %c0 = arith.constant 0 : index
    %c0_0 = arith.constant 0 : index
    %c0_1 = arith.constant 0 : index
    %0 = vector.load %arg1[%c0, %c0_0, %c0_1] : memref<2x16x768xbf16, #tpu.memory_space<vmem>>, vector<2x16x768xbf16>
    %1 = vector.shape_cast %0 : vector<2x16x768xbf16> to vector<32x768xbf16>
    %c0_2 = arith.constant 0 : index
    %c0_3 = arith.constant 0 : index
    %2 = vector.load %arg2[%c0_2, %c0_3] : memref<768x384xbf16, #tpu.memory_space<vmem>>, vector<768x384xbf16>
    %cst = arith.constant dense<0.000000e+00> : vector<32x384xf32>
    %3 = tpu.matmul %1, %2, %cst {dimension_numbers = #tpu.dot_dimension_numbers<[1], [0], [0], [1], [0, 0, 1, 1], [], []>} : vector<32x768xbf16>, vector<768x384xbf16>, vector<32x384xf32> -> vector<32x384xf32>
    %4 = vector.shape_cast %3 : vector<32x384xf32> to vector<2x16x384xf32>
    %5 = vector.extract_strided_slice %4 {offsets = [0, 0, 0], sizes = [2, 16, 64], strides = [1, 1, 1]} : vector<2x16x384xf32> to vector<2x16x64xf32>
    %cst_4 = arith.constant dense<0xFF800000> : vector<2x64xf32>
    %6 = vector.multi_reduction <maximumf>, %5, %cst_4 [1] : vector<2x16x64xf32> to vector<2x64xf32>
    %7 = vector.extract_strided_slice %4 {offsets = [0, 0, 64], sizes = [2, 15, 64], strides = [1, 1, 1]} : vector<2x16x384xf32> to vector<2x15x64xf32>
    %8 = vector.extract_strided_slice %4 {offsets = [0, 1, 128], sizes = [2, 15, 64], strides = [1, 1, 1]} : vector<2x16x384xf32> to vector<2x15x64xf32>
    %9 = arith.addf %7, %8 : vector<2x15x64xf32>
    %cst_5 = arith.constant dense<0xFF800000> : vector<2x64xf32>
    %10 = vector.multi_reduction <maximumf>, %9, %cst_5 [1] : vector<2x15x64xf32> to vector<2x64xf32>
    %11 = vector.extract_strided_slice %4 {offsets = [0, 0, 192], sizes = [2, 14, 64], strides = [1, 1, 1]} : vector<2x16x384xf32> to vector<2x14x64xf32>
    %12 = vector.extract_strided_slice %4 {offsets = [0, 1, 256], sizes = [2, 14, 64], strides = [1, 1, 1]} : vector<2x16x384xf32> to vector<2x14x64xf32>
    %13 = arith.addf %11, %12 : vector<2x14x64xf32>
    %14 = vector.extract_strided_slice %4 {offsets = [0, 2, 320], sizes = [2, 14, 64], strides = [1, 1, 1]} : vector<2x16x384xf32> to vector<2x14x64xf32>
    %15 = arith.addf %13, %14 : vector<2x14x64xf32>
    %cst_6 = arith.constant dense<0xFF800000> : vector<2x64xf32>
    %16 = vector.multi_reduction <maximumf>, %15, %cst_6 [1] : vector<2x14x64xf32> to vector<2x64xf32>
    %17 = tpu.concatenate %6, %10, %16 in 1 : vector<2x64xf32>, vector<2x64xf32>, vector<2x64xf32> -> vector<2x192xf32>
    %c0_7 = arith.constant 0 : index
    %c0_8 = arith.constant 0 : index
    %18 = vector.load %arg3[%c0_7, %c0_8] : memref<1x192xf32, #tpu.memory_space<vmem>>, vector<1x192xf32>
    %19 = vector.broadcast %18 : vector<1x192xf32> to vector<2x192xf32>
    %20 = arith.addf %17, %19 : vector<2x192xf32>
    %cst_9 = arith.constant 0.000000e+00 : f32
    %21 = vector.broadcast %cst_9 : f32 to vector<2x192xf32>
    %22 = arith.maximumf %20, %21 : vector<2x192xf32>
    %c0_10 = arith.constant 0 : index
    %c0_11 = arith.constant 0 : index
    %23 = vector.load %arg4[%c0_10, %c0_11] : memref<2x192xf32, #tpu.memory_space<vmem>>, vector<2x192xf32>
    tpu.vector_store %arg4[%c0_10, %c0_11], %22 {strides = array<i32>} : memref<2x192xf32, #tpu.memory_space<vmem>>, vector<2x192xf32>,
    return
  }
  func.func @transform_0(%arg0: i32) -> (i32, i32, i32) {
    %c0_i32 = arith.constant 0 : i32
    %c0_i32_0 = arith.constant 0 : i32
    %c0_i32_1 = arith.constant 0 : i32
    return %arg0, %c0_i32, %c0_i32_0 : i32, i32, i32
  }
  func.func @transform_1(%arg0: i32) -> (i32, i32) {
    %c0_i32 = arith.constant 0 : i32
    %c0_i32_0 = arith.constant 0 : i32
    %c0_i32_1 = arith.constant 0 : i32
    return %c0_i32, %c0_i32_0 : i32, i32
  }
  func.func @transform_2(%arg0: i32) -> (i32, i32) {
    %c0_i32 = arith.constant 0 : i32
    %c0_i32_0 = arith.constant 0 : i32
    %c0_i32_1 = arith.constant 0 : i32
    return %c0_i32, %c0_i32_0 : i32, i32
  }
  func.func @transform_3(%arg0: i32) -> (i32, i32) {
    %c0_i32 = arith.constant 0 : i32
    %c0_i32_0 = arith.constant 0 : i32
    return %arg0, %c0_i32 : i32, i32
  }
}

</mosaic_0001>

<bundles_post_ra>
// kernel: tpu_custom_call.1
= control target key start
LH: loop header
LB: loop body
LE: loop exit
PB: predicated region body
PF: predicated region fallthrough
CT: control target
= control target key end

     0   :  { %8 = vsyncpa [#allocation3], 0  ;;  %s2300_s0 = inlined_call_operand.hbm [shape: bf16[2,16,768], index: 0, kind: input, shape index: {}]   ;;  %s2301_s1 = inlined_call_operand.hbm [shape: bf16[768,384], index: 1, kind: input, shape index: {}]   ;;  %s2302_s2 = inlined_call_operand.vmem [shape: f32[1,192], index: 2, kind: input, shape index: {}]   ;;  %s2303_s3 = inlined_call_operand.hbm [shape: f32[2,192], index: 3, kind: output, shape index: {}]  }
   0x1   :  { %9 = vsyncpa [#allocation6], 0 }
   0x2   :  { %10 = vsyncpa [#allocation4], 0  ;;  %s2134_s12 = smov [#allocation2]   ;;  %s2062_s16 = scalar_lea.hbm %s2300_s0, 1536 }
   0x3   :  { %s16_s13 = sshll.u32 %s2134_s12, 4  ;;  %p2063_p0 = scmp.ne.s32.totalorder %s2300_s0, %s2062_s16  ;;  %s17_s13 = int_to_ptr.vmem [resolvable:$true] %s16_s13 }
   0x4   :  { %p2066_p1 = scmp.lt.u32.totalorder %s2062_s16, %s2300_s0 }
   0x6   :  { %p2068_p2 = pnand %p2066_p1, %p2063_p0 }
   0x8   :  { %2071 = shalt.err (!%p2068_p2)
}
   0x9   :  { %s2072_s21 = scalar_lea.vmem %s17_s13, 1536  ;;  %p2077_p4 = scmp.lt.s32.totalorder %s17_s13, %s17_s13 }
   0xa   :  { %p2073_p3 = scmp.ne.s32.totalorder %s17_s13, %s2072_s21  ;;  %p2078_p5 = scmp.lt.s32.totalorder %s2072_s21, %s2072_s21 }
   0xc   :  { %p2079_p6 = por %p2078_p5, %p2077_p4 }
   0xe   :  { %p2080_p7 = pnand %p2079_p6, %p2073_p3 }
  0x10   :  { %2083 = shalt.err (!%p2080_p7)
}
  0x11   :  { %s2135_s22 = smov 384   ;;  %s2136_s23 = smov 24  }
  0x12   :  { %22 = dma.hbm_to_vmem [thread:$0]  %s2300_s0, 1536, %s17_s13, [#allocation3], %s2135_s22, %s2135_s22, %s2136_s23  }
  0x13   :  { %s2137_s26 = smov [#allocation5]   ;;  %s2084_s30 = scalar_lea.hbm %s2301_s1, 18432 }
  0x14   :  { %s28_s27 = sshll.u32 %s2137_s26, 4  ;;  %p2085_p8 = scmp.ne.s32.totalorder %s2301_s1, %s2084_s30  ;;  %s29_s27 = int_to_ptr.vmem [resolvable:$true] %s28_s27 }
  0x15   :  { %p2088_p9 = scmp.lt.u32.totalorder %s2084_s30, %s2301_s1 }
  0x17   :  { %p2090_p10 = pnand %p2088_p9, %p2085_p8 }
  0x19   :  { %2093 = shalt.err (!%p2090_p10)
}
  0x1a   :  { %s2094_s8 = scalar_lea.vmem %s29_s27, 18432  ;;  %p2099_p12 = scmp.lt.s32.totalorder %s29_s27, %s29_s27 }
  0x1b   :  { %p2095_p11 = scmp.ne.s32.totalorder %s29_s27, %s2094_s8  ;;  %p2100_p13 = scmp.lt.s32.totalorder %s2094_s8, %s2094_s8 }
  0x1d   :  { %p2101_p0 = por %p2100_p13, %p2099_p12 }
  0x1f   :  { %p2102_p1 = pnand %p2101_p0, %p2095_p11 }
  0x21   :  { %2105 = shalt.err (!%p2102_p1)
}
  0x22   :  { %s2138_s0 = smov 192   ;;  %s2139_s9 = smov 12  }
  0x23   :  { %34 = dma.hbm_to_vmem [thread:$0]  %s2301_s1, 18432, %s29_s27, [#allocation6], %s2138_s0, %s2138_s0, %s2139_s9  }
  0x24   :  { %2128 = dma.done.wait [#allocation3], 1536  }
  0x25   :  { %2129 = vsyncadd [#allocation3], 4294965760 }
  0x26   :  { %2130 = dma.done.wait [#allocation6], 18432  }
  0x27   :  { %2131 = vsyncadd [#allocation6], 4294948864  ;;  %v1852_v0 = vld [vmem:[#allocation5 + $0x4] ss:$12 sps:$4 sm:$0xff]   ;;  %v1856_v2 = vld [vmem:[#allocation5] ss:$12 sps:$4 sm:$0xff]  }
  0x28   :  { %v1854_v1 = vld [vmem:[#allocation5 + $0x184] ss:$12 sps:$4 sm:$0xff]   ;;  %1076 = vmatprep.subr.bf16.mxu1 %v1852_v0  ;;  %v1857_v3 = vld [vmem:[#allocation5 + $0x180] ss:$12 sps:$4 sm:$0xff]   ;;  %v1858_v4 = vld [vmem:[#allocation5 + $0x1c] ss:$12 sps:$4 sm:$0xff]  }
  0x29   :  { %1129 = vmatprep.subr.bf16.mxu0 %v1854_v1  ;;  %1077 = vmatpush1.bf16.msra.mxu1 %v1856_v2  ;;  %v1860_v5 = vld [vmem:[#allocation5 + $0x19c] ss:$12 sps:$4 sm:$0xff]   ;;  %v1862_v6 = vld [vmem:[#allocation5 + $0x18] ss:$12 sps:$4 sm:$0xff]   ;;  %v1864_v8 = vld [vmem:[#allocation5 + $0x34] ss:$12 sps:$4 sm:$0xff]  }
  0x2a   :  { %1130 = vmatpush1.bf16.msra.mxu0 %v1857_v3  ;;  %1078 = vmatprep.subr.bf16.mxu1 %v1858_v4  ;;  %v1863_v7 = vld [vmem:[#allocation5 + $0x198] ss:$12 sps:$4 sm:$0xff]   ;;  %v1866_v9 = vld [vmem:[#allocation5 + $0x1b4] ss:$12 sps:$4 sm:$0xff]   ;;  %v1868_v10 = vld [vmem:[#allocation5 + $0x30] ss:$12 sps:$4 sm:$0xff]  }
  0x2b   :  { %1131 = vmatprep.subr.bf16.mxu0 %v1860_v5  ;;  %v1869_v11 = vld [vmem:[#allocation5 + $0x1b0] ss:$12 sps:$4 sm:$0xff]   ;;  %v1870_v12 = vld [vmem:[#allocation5 + $0x4c] ss:$12 sps:$4 sm:$0xff]   ;;  %v1874_v14 = vld [vmem:[#allocation5 + $0x48] ss:$12 sps:$4 sm:$0xff]  }
  0x2c   :  { %v1872_v13 = vld [vmem:[#allocation5 + $0x1cc] ss:$12 sps:$4 sm:$0xff]   ;;  %v1875_v15 = vld [vmem:[#allocation5 + $0x1c8] ss:$12 sps:$4 sm:$0xff]   ;;  %v1876_v16 = vld [vmem:[#allocation5 + $0x64] ss:$12 sps:$4 sm:$0xff]  }
  0x2d   :  { %1079 = vmatpush1.bf16.msra.mxu1 %v1862_v6  ;;  %v1878_v17 = vld [vmem:[#allocation5 + $0x1e4] ss:$12 sps:$4 sm:$0xff]   ;;  %v1880_v18 = vld [vmem:[#allocation5 + $0x60] ss:$12 sps:$4 sm:$0xff]   ;;  %v1882_v20 = vld [vmem:[#allocation5 + $0x7c] ss:$12 sps:$4 sm:$0xff]  }
  0x2e   :  { %1132 = vmatpush1.bf16.msra.mxu0 %v1863_v7  ;;  %1080 = vmatprep.subr.bf16.mxu1 %v1864_v8  ;;  %v1881_v19 = vld [vmem:[#allocation5 + $0x1e0] ss:$12 sps:$4 sm:$0xff]   ;;  %v1884_v21 = vld [vmem:[#allocation5 + $0x1fc] ss:$12 sps:$4 sm:$0xff]   ;;  %v1886_v22 = vld [vmem:[#allocation5 + $0x78] ss:$12 sps:$4 sm:$0xff]  }
  0x2f   :  { %1133 = vmatprep.subr.bf16.mxu0 %v1866_v9  ;;  %v1887_v23 = vld [vmem:[#allocation5 + $0x1f8] ss:$12 sps:$4 sm:$0xff]   ;;  %v1888_v24 = vld [vmem:[#allocation5 + $0x94] ss:$12 sps:$4 sm:$0xff]   ;;  %v1892_v26 = vld [vmem:[#allocation5 + $0x90] ss:$12 sps:$4 sm:$0xff]  }
  0x30   :  { %v1890_v25 = vld [vmem:[#allocation5 + $0x214] ss:$12 sps:$4 sm:$0xff]   ;;  %v1893_v27 = vld [vmem:[#allocation5 + $0x210] ss:$12 sps:$4 sm:$0xff]   ;;  %v1894_v28 = vld [vmem:[#allocation5 + $0xac] ss:$12 sps:$4 sm:$0xff]  }
  0x31   :  { %1081 = vmatpush1.bf16.msra.mxu1 %v1868_v10  ;;  %v1896_v29 = vld [vmem:[#allocation5 + $0x22c] ss:$12 sps:$4 sm:$0xff]   ;;  %v1898_v30 = vld [vmem:[#allocation5 + $0xa8] ss:$12 sps:$4 sm:$0xff]   ;;  %v1900_v32 = vld [vmem:[#allocation5 + $0xc4] ss:$12 sps:$4 sm:$0xff]  }
  0x32   :  { %1134 = vmatpush1.bf16.msra.mxu0 %v1869_v11  ;;  %1082 = vmatprep.subr.bf16.mxu1 %v1870_v12  ;;  %v1899_v31 = vld [vmem:[#allocation5 + $0x228] ss:$12 sps:$4 sm:$0xff]   ;;  %v1902_v33 = vld [vmem:[#allocation5 + $0x244] ss:$12 sps:$4 sm:$0xff]   ;;  %v1904_v34 = vld [vmem:[#allocation5 + $0xc0] ss:$12 sps:$4 sm:$0xff]  }
  0x33   :  { %1135 = vmatprep.subr.bf16.mxu0 %v1872_v13  ;;  %v1905_v35 = vld [vmem:[#allocation5 + $0x240] ss:$12 sps:$4 sm:$0xff]   ;;  %v1906_v36 = vld [vmem:[#allocation5 + $0xdc] ss:$12 sps:$4 sm:$0xff]   ;;  %v1910_v38 = vld [vmem:[#allocation5 + $0xd8] ss:$12 sps:$4 sm:$0xff]  }
  0x34   :  { %v1908_v37 = vld [vmem:[#allocation5 + $0x25c] ss:$12 sps:$4 sm:$0xff]   ;;  %v1911_v39 = vld [vmem:[#allocation5 + $0x258] ss:$12 sps:$4 sm:$0xff]   ;;  %v1912_v40 = vld [vmem:[#allocation5 + $0xf4] ss:$12 sps:$4 sm:$0xff]  }
  0x35   :  { %1083 = vmatpush1.bf16.msra.mxu1 %v1874_v14  ;;  %v1914_v41 = vld [vmem:[#allocation5 + $0x274] ss:$12 sps:$4 sm:$0xff]   ;;  %v1916_v42 = vld [vmem:[#allocation5 + $0xf0] ss:$12 sps:$4 sm:$0xff]   ;;  %v1918_v44 = vld [vmem:[#allocation5 + $0x10c] ss:$12 sps:$4 sm:$0xff]  }
  0x36   :  { %1136 = vmatpush1.bf16.msra.mxu0 %v1875_v15  ;;  %1084 = vmatprep.subr.bf16.mxu1 %v1876_v16  ;;  %v1917_v43 = vld [vmem:[#allocation5 + $0x270] ss:$12 sps:$4 sm:$0xff]   ;;  %v1920_v45 = vld [vmem:[#allocation5 + $0x28c] ss:$12 sps:$4 sm:$0xff]   ;;  %v1922_v46 = vld [vmem:[#allocation5 + $0x108] ss:$12 sps:$4 sm:$0xff]  }
  0x37   :  { %1137 = vmatprep.subr.bf16.mxu0 %v1878_v17  ;;  %v1923_v47 = vld [vmem:[#allocation5 + $0x288] ss:$12 sps:$4 sm:$0xff]   ;;  %v1924_v48 = vld [vmem:[#allocation5 + $0x124] ss:$12 sps:$4 sm:$0xff]   ;;  %v1928_v52 = vld [vmem:[#allocation5 + $0x120] ss:$12 sps:$4 sm:$0xff]  }
  0x38   :  { %v2187_v49 = vld [vmem:[#allocation2 + $0x4] ss:$24 sps:$4 sm:$0xff]   ;;  %v1929_v53 = vld [vmem:[#allocation5 + $0x2a0] ss:$12 sps:$4 sm:$0xff]   ;;  %v1946_v0 = vld [vmem:[#allocation5 + $0x168] ss:$12 sps:$4 sm:$0xff]  }
  0x39   :  { %1085 = vmatpush1.bf16.msra.mxu1 %v1880_v18  ;;  %v1926_v50 = vld [vmem:[#allocation5 + $0x2a4] ss:$12 sps:$4 sm:$0xff]   ;;  %1108 = vmatprep.mubr.bf16.mxu1 %v2187_v49  ;;  %v1930_v54 = vld [vmem:[#allocation5 + $0x13c] ss:$12 sps:$4 sm:$0xff]   ;;  %v1936_v58 = vld [vmem:[#allocation5 + $0x154] ss:$12 sps:$4 sm:$0xff]  }
  0x3a   :  { %1138 = vmatpush1.bf16.msra.mxu0 %v1881_v19  ;;  %1086 = vmatprep.subr.bf16.mxu1 %v1882_v20  ;;  %v2189_v51 = vld [vmem:[#allocation2 + $0xc] ss:$24 sps:$4 sm:$0xff]   ;;  %v1932_v55 = vld [vmem:[#allocation5 + $0x2bc] ss:$12 sps:$4 sm:$0xff]   ;;  %v1938_v59 = vld [vmem:[#allocation5 + $0x2d4] ss:$12 sps:$4 sm:$0xff]  }
  0x3b   :  { %1139 = vmatprep.subr.bf16.mxu0 %v1884_v21  ;;  %1161 = vmatprep.mubr.bf16.mxu0 %v2189_v51  ;;  %v1934_v56 = vld [vmem:[#allocation5 + $0x138] ss:$12 sps:$4 sm:$0xff]   ;;  %v1940_v60 = vld [vmem:[#allocation5 + $0x150] ss:$12 sps:$4 sm:$0xff]   ;;  %v1947_v1 = vld [vmem:[#allocation5 + $0x2e8] ss:$12 sps:$4 sm:$0xff]  }
  0x3c   :  { %v1935_v57 = vld [vmem:[#allocation5 + $0x2b8] ss:$12 sps:$4 sm:$0xff]   ;;  %v1941_v61 = vld [vmem:[#allocation5 + $0x2d0] ss:$12 sps:$4 sm:$0xff]   ;;  %v2195_v4 = vld [vmem:[#allocation2 + $0x8] ss:$24 sps:$4 sm:$0xff]  }
  0x3d   :  { %1087 = vmatpush1.bf16.msra.mxu1 %v1886_v22  ;;  %v1942_v62 = vld [vmem:[#allocation5 + $0x16c] ss:$12 sps:$4 sm:$0xff]   ;;  %v1956_v2 = vld [vmem:[#allocation5 + $0x304] ss:$12 sps:$4 sm:$0xff]   ;;  %v1957_v5 = vld [vmem:[#allocation5 + $0xc8] ss:$12 sps:$4 sm:$0xff]  }
  0x3e   :  { %1140 = vmatpush1.bf16.msra.mxu0 %v1887_v23  ;;  %1088 = vmatprep.subr.bf16.mxu1 %v1888_v24  ;;  %v1944_v63 = vld [vmem:[#allocation5 + $0x2ec] ss:$12 sps:$4 sm:$0xff]   ;;  %v1958_v7 = vld [vmem:[#allocation5 + $0x8] ss:$12 sps:$4 sm:$0xff]   ;;  %v1964_v15 = vld [vmem:[#allocation5 + $0x330] ss:$12 sps:$4 sm:$0xff]  }
  0x3f   :  { %1141 = vmatprep.subr.bf16.mxu0 %v1890_v25  ;;  %v2193_v3 = vld [vmem:[#allocation2] ss:$24 sps:$4 sm:$0xff]   ;;  %v1961_v8 = vld [vmem:[#allocation5 + $0x31c] ss:$12 sps:$4 sm:$0xff]   ;;  %v2197_v10 = vld [vmem:[#allocation2 + $0x34] ss:$24 sps:$4 sm:$0xff]  }
  0x40   :  { %v1954_v6 = vld [vmem:[#allocation5 + $0x300] ss:$12 sps:$4 sm:$0xff]   ;;  %v1959_v11 = vld [vmem:[#allocation5 + $0x318] ss:$12 sps:$4 sm:$0xff]   ;;  %v2202_v17 = vld [vmem:[#allocation2 + $0x30] ss:$24 sps:$4 sm:$0xff]  }
  0x41   :  { %1089 = vmatpush1.bf16.msra.mxu1 %v1892_v26  ;;  %v1962_v9 = vld [vmem:[#allocation5 + $0xe0] ss:$12 sps:$4 sm:$0xff]   ;;  %v1967_v14 = vld [vmem:[#allocation5 + $0xf8] ss:$12 sps:$4 sm:$0xff]   ;;  %v1972_v19 = vld [vmem:[#allocation5 + $0x110] ss:$12 sps:$4 sm:$0xff]  }
  0x42   :  { %1142 = vmatpush1.bf16.msra.mxu0 %v1893_v27  ;;  %1090 = vmatprep.subr.bf16.mxu1 %v1894_v28  ;;  %v1963_v12 = vld [vmem:[#allocation5 + $0x20] ss:$12 sps:$4 sm:$0xff]   ;;  %v1968_v16 = vld [vmem:[#allocation5 + $0x38] ss:$12 sps:$4 sm:$0xff]   ;;  %v1969_v20 = vld [vmem:[#allocation5 + $0x348] ss:$12 sps:$4 sm:$0xff]  }
  0x43   :  { %1143 = vmatprep.subr.bf16.mxu0 %v1896_v29  ;;  %v1966_v13 = vld [vmem:[#allocation5 + $0x334] ss:$12 sps:$4 sm:$0xff]   ;;  %v1971_v18 = vld [vmem:[#allocation5 + $0x34c] ss:$12 sps:$4 sm:$0xff]   ;;  %v1973_v21 = vld [vmem:[#allocation5 + $0x50] ss:$12 sps:$4 sm:$0xff]  }
  0x44   :  { %v1976_v22 = vld [vmem:[#allocation5 + $0x364] ss:$12 sps:$4 sm:$0xff]   ;;  %v1977_v23 = vld [vmem:[#allocation5 + $0x128] ss:$12 sps:$4 sm:$0xff]   ;;  %v1974_v24 = vld [vmem:[#allocation5 + $0x360] ss:$12 sps:$4 sm:$0xff]  }
  0x45   :  { %1091 = vmatpush1.bf16.msra.mxu1 %v1898_v30  ;;  %v1978_v25 = vld [vmem:[#allocation5 + $0x68] ss:$12 sps:$4 sm:$0xff]   ;;  %v1982_v27 = vld [vmem:[#allocation5 + $0x140] ss:$12 sps:$4 sm:$0xff]   ;;  %v1979_v28 = vld [vmem:[#allocation5 + $0x378] ss:$12 sps:$4 sm:$0xff]  }
  0x46   :  { %1144 = vmatpush1.bf16.msra.mxu0 %v1899_v31  ;;  %1092 = vmatprep.subr.bf16.mxu1 %v1900_v32  ;;  %v1981_v26 = vld [vmem:[#allocation5 + $0x37c] ss:$12 sps:$4 sm:$0xff]   ;;  %v1985_v29 = vld [vmem:[#allocation5 + $0x80] ss:$12 sps:$4 sm:$0xff]   ;;  %v1990_v31 = vld [vmem:[#allocation5 + $0x158] ss:$12 sps:$4 sm:$0xff]  }
  0x47   :  { %1145 = vmatprep.subr.bf16.mxu0 %v1902_v33  ;;  %v1989_v30 = vld [vmem:[#allocation5 + $0x394] ss:$12 sps:$4 sm:$0xff]   ;;  %v1987_v32 = vld [vmem:[#allocation5 + $0x390] ss:$12 sps:$4 sm:$0xff]   ;;  %v1991_v33 = vld [vmem:[#allocation5 + $0x98] ss:$12 sps:$4 sm:$0xff]  }
  0x48   :  { %vm1382_vm0 = vcmask 523264   ;;  %vm1510_vm1 = vcmask 1041409   ;;  %vm1474_vm2 = vcmask 1045504   ;;  %vm1405_vm3 = vcmask 1046528   ;;  %s2140_s1 = smov 64   ;;  %s2142_s14 = smov [#allocation7]  }
  0x49   :  { %1093 = vmatpush1.bf16.msra.mxu1 %v1904_v34  ;;  %v1994_v34 = vld [vmem:[#allocation5 + $0x3ac] ss:$12 sps:$4 sm:$0xff]   ;;  %vm1428_vm4 = vcmask 1048064   ;;  %vm1490_vm5 = vcmask 1046016   ;;  %vm1430_vm6 = vcmask 1047040   ;;  %vm1551_vm7 = vcmask 1041408  }
  0x4a   :  { %1146 = vmatpush1.bf16.msra.mxu0 %v1905_v35  ;;  %1094 = vmatprep.subr.bf16.mxu1 %v1906_v36  ;;  %v1995_v35 = vld [vmem:[#allocation5 + $0x170] ss:$12 sps:$4 sm:$0xff]   ;;  %v1992_v36 = vld [vmem:[#allocation5 + $0x3a8] ss:$12 sps:$4 sm:$0xff]   ;;  %vm1552_vm8 = vcmask 519170   ;;  %s1561_s15 = sshll.u32 %s2142_s14, 4  ;;  %s1562_s15 = int_to_ptr.vmem [resolvable:$true] %s1561_s15 }
  0x4b   :  { %1147 = vmatprep.subr.bf16.mxu0 %v1908_v37  ;;  %v1996_v37 = vld [vmem:[#allocation5 + $0xb0] ss:$12 sps:$4 sm:$0xff]   ;;  %vm1553_vm9 = vmor %vm1552_vm8, %vm1551_vm7  ;;  %p2111_p3 = scmp.lt.s32.totalorder %s1562_s15, %s1562_s15 }
  0x4d   :  { %1095 = vmatpush1.bf16.msra.mxu1 %v1910_v38  ;;  %v1999_v38 = vld [vmem:[#allocation5 + $0x3c4] ss:$12 sps:$4 sm:$0xff]  }
  0x4e   :  { %1148 = vmatpush1.bf16.msra.mxu0 %v1911_v39  ;;  %1096 = vmatprep.subr.bf16.mxu1 %v1912_v40  ;;  %v2000_v39 = vld [vmem:[#allocation5 + $0x248] ss:$12 sps:$4 sm:$0xff]   ;;  %v1997_v40 = vld [vmem:[#allocation5 + $0x3c0] ss:$12 sps:$4 sm:$0xff]  }
  0x4f   :  { %1149 = vmatprep.subr.bf16.mxu0 %v1914_v41  ;;  %v2206_v41 = vld [vmem:[#allocation2 + $0x3c] ss:$24 sps:$4 sm:$0xff]  }
  0x51   :  { %1097 = vmatpush1.bf16.msra.mxu1 %v1916_v42  ;;  %v2001_v42 = vld [vmem:[#allocation5 + $0x188] ss:$12 sps:$4 sm:$0xff]  }
  0x52   :  { %1150 = vmatpush1.bf16.msra.mxu0 %v1917_v43  ;;  %1098 = vmatprep.subr.bf16.mxu1 %v1918_v44  ;;  %v2208_v43 = vld [vmem:[#allocation2 + $0x38] ss:$24 sps:$4 sm:$0xff]   ;;  %v2004_v44 = vld [vmem:[#allocation5 + $0x3dc] ss:$12 sps:$4 sm:$0xff]  }
  0x53   :  { %1151 = vmatprep.subr.bf16.mxu0 %v1920_v45  ;;  %v2005_v45 = vld [vmem:[#allocation5 + $0x260] ss:$12 sps:$4 sm:$0xff]  }
  0x55   :  { %1099 = vmatpush1.bf16.msra.mxu1 %v1922_v46  ;;  %v2002_v46 = vld [vmem:[#allocation5 + $0x3d8] ss:$12 sps:$4 sm:$0xff]  }
  0x56   :  { %1152 = vmatpush1.bf16.msra.mxu0 %v1923_v47  ;;  %1100 = vmatprep.subr.bf16.mxu1 %v1924_v48  ;;  %v2006_v47 = vld [vmem:[#allocation5 + $0x1a0] ss:$12 sps:$4 sm:$0xff]  }
  0x57   :  { %1153 = vmatprep.subr.bf16.mxu0 %v1926_v50  ;;  %v2009_v48 = vld [vmem:[#allocation5 + $0x3f4] ss:$12 sps:$4 sm:$0xff]   ;;  %v2007_v50 = vld [vmem:[#allocation5 + $0x3f0] ss:$12 sps:$4 sm:$0xff]  }
  0x59   :  { %1101 = vmatpush1.bf16.msra.mxu1 %v1928_v52  ;;  %v2214_v52 = vld [vmem:[#allocation2 + $0x14] ss:$24 sps:$4 sm:$0xff]  }
  0x5a   :  { %1154 = vmatpush1.bf16.msra.mxu0 %v1929_v53  ;;  %1102 = vmatprep.subr.bf16.mxu1 %v1930_v54  ;;  %v2011_v53 = vld [vmem:[#allocation5 + $0x1b8] ss:$12 sps:$4 sm:$0xff]  }
  0x5b   :  { %1155 = vmatprep.subr.bf16.mxu0 %v1932_v55  ;;  %v2014_v54 = vld [vmem:[#allocation5 + $0x40c] ss:$12 sps:$4 sm:$0xff]   ;;  %v2015_v55 = vld [vmem:[#allocation5 + $0x290] ss:$12 sps:$4 sm:$0xff]  }
  0x5d   :  { %1103 = vmatpush1.bf16.msra.mxu1 %v1934_v56  ;;  %v2012_v56 = vld [vmem:[#allocation5 + $0x408] ss:$12 sps:$4 sm:$0xff]  }
  0x5e   :  { %1156 = vmatpush1.bf16.msra.mxu0 %v1935_v57  ;;  %1104 = vmatprep.subr.bf16.mxu1 %v1936_v58  ;;  %v2016_v57 = vld [vmem:[#allocation5 + $0x1d0] ss:$12 sps:$4 sm:$0xff]  }
  0x5f   :  { %1157 = vmatprep.subr.bf16.mxu0 %v1938_v59  ;;  %v2019_v58 = vld [vmem:[#allocation5 + $0x424] ss:$12 sps:$4 sm:$0xff]   ;;  %v2020_v59 = vld [vmem:[#allocation5 + $0x2a8] ss:$12 sps:$4 sm:$0xff]  }
  0x61   :  { %1105 = vmatpush1.bf16.msra.mxu1 %v1940_v60  ;;  %v2017_v60 = vld [vmem:[#allocation5 + $0x420] ss:$12 sps:$4 sm:$0xff]  }
  0x62   :  { %1158 = vmatpush1.bf16.msra.mxu0 %v1941_v61  ;;  %1106 = vmatprep.subr.bf16.mxu1 %v1942_v62  ;;  %v2021_v61 = vld [vmem:[#allocation5 + $0x1e8] ss:$12 sps:$4 sm:$0xff]  }
  0x63   :  { %1159 = vmatprep.subr.bf16.mxu0 %v1944_v63  ;;  %v2024_v62 = vld [vmem:[#allocation5 + $0x43c] ss:$12 sps:$4 sm:$0xff]   ;;  %v2025_v63 = vld [vmem:[#allocation5 + $0x2c0] ss:$12 sps:$4 sm:$0xff]  }
  0x65   :  { %1107 = vmatpush1.bf16.msra.mxu1 %v1946_v0  ;;  %v2022_v0 = vld [vmem:[#allocation5 + $0x438] ss:$12 sps:$4 sm:$0xff]  }
  0x66   :  { %1160 = vmatpush1.bf16.msra.mxu0 %v1947_v1  ;;  %1727 = vmatprep.subr.bf16.mxu1 %v1957_v5  ;;  %v2026_v1 = vld [vmem:[#allocation5 + $0x200] ss:$12 sps:$4 sm:$0xff]   ;;  %v2030_v5 = vld [vmem:[#allocation5 + $0x450] ss:$12 sps:$4 sm:$0xff]  }
  0x67   :  { %1182 = vmatprep.subr.bf16.mxu0 %v1956_v2  ;;  %v2032_v2 = vld [vmem:[#allocation5 + $0x454] ss:$12 sps:$4 sm:$0xff]  }
  0x68   :  { %1109 = vmatmul.mubr.bf16.vlgmr.msra.gmra.mrb[0].mxu1 %v2193_v3 }
  0x69   :  { %1162 = vmatmul.mubr.bf16.vlgmr.msra.gmra.mrb[0].mxu0 %v2195_v4  ;;  %1728 = vmatpush3.bf16.msra.mxu1 %v1958_v7  ;;  %v2038_v7 = vld [vmem:[#allocation5 + $0x2f0] ss:$12 sps:$4 sm:$0xff]  }
  0x6a   :  { %1183 = vmatpush1.bf16.msra.mxu0 %v1954_v6  ;;  %1729 = vmatprep.subr.bf16.mxu1 %v1962_v9  ;;  %v2034_v6 = vld [vmem:[#allocation5 + $0x218] ss:$12 sps:$4 sm:$0xff]   ;;  %v2039_v9 = vld [vmem:[#allocation5 + $0x230] ss:$12 sps:$4 sm:$0xff]  }
  0x6b   :  { %1184 = vmatprep.subr.bf16.mxu0 %v1961_v8  ;;  %1118 = vmatprep.mubr.bf16.mxu1 %v2197_v10  ;;  %v2035_v8 = vld [vmem:[#allocation5 + $0x468] ss:$12 sps:$4 sm:$0xff]  }
  0x6c   :  { %1171 = vmatprep.mubr.bf16.mxu0 %v2206_v41 }
  0x6d   :  { %1730 = vmatpush3.bf16.msra.mxu1 %v1963_v12  ;;  %v2044_v12 = vld [vmem:[#allocation5 + $0x308] ss:$12 sps:$4 sm:$0xff]  }
  0x6e   :  { %1185 = vmatpush1.bf16.msra.mxu0 %v1959_v11  ;;  %1731 = vmatprep.subr.bf16.mxu1 %v1967_v14  ;;  %v2040_v11 = vld [vmem:[#allocation2 + $0x10] ss:$24 sps:$4 sm:$0xff]   ;;  %v2047_v14 = vld [vmem:[#allocation2 + $0x44] ss:$24 sps:$4 sm:$0xff]  }
  0x6f   :  { %1186 = vmatprep.subr.bf16.mxu0 %v1966_v13  ;;  %v2045_v13 = vld [vmem:[#allocation5 + $0x3e0] ss:$12 sps:$4 sm:$0xff]  }
  0x70   :  { %1119 = vmatmul.mubr.bf16.gmra.mrb[4].mxu1 %v2202_v17 }
  0x71   :  { %1732 = vmatpush3.bf16.msra.mxu1 %v1968_v16  ;;  %1267 = vmatprep.mubr.bf16.mxu1 %v2187_v49  ;;  %v2010_v49 = vld [vmem:[#allocation5 + $0x278] ss:$12 sps:$4 sm:$0xff]  }
  0x72   :  { %1187 = vmatpush1.bf16.msra.mxu0 %v1964_v15  ;;  %1733 = vmatprep.subr.bf16.mxu1 %v1972_v19  ;;  %v2046_v15 = vld [vmem:[#allocation5 + $0x320] ss:$12 sps:$4 sm:$0xff]   ;;  %v2050_v16 = vld [vmem:[#allocation5 + $0x3f8] ss:$12 sps:$4 sm:$0xff]   ;;  %v2052_v19 = vld [vmem:[#allocation5 + $0x410] ss:$12 sps:$4 sm:$0xff]  }
  0x73   :  { %1188 = vmatprep.subr.bf16.mxu0 %v1971_v18  ;;  %1172 = vmatmul.mubr.bf16.gmra.mrb[4].mxu0 %v2208_v43  ;;  %v2051_v18 = vld [vmem:[#allocation5 + $0x338] ss:$12 sps:$4 sm:$0xff]  }
  0x74   :  { %1214 = vmatprep.mubr.bf16.mxu0 %v2214_v52 }
  0x75   :  { %1734 = vmatpush3.bf16.msra.mxu1 %v1973_v21  ;;  %v2055_v21 = vld [vmem:[#allocation5 + $0x368] ss:$12 sps:$4 sm:$0xff]  }
  0x76   :  { %1189 = vmatpush1.bf16.msra.mxu0 %v1969_v20  ;;  %1735 = vmatprep.subr.bf16.mxu1 %v1977_v23  ;;  %v2054_v20 = vld [vmem:[#allocation5 + $0x428] ss:$12 sps:$4 sm:$0xff]   ;;  %v2057_v23 = vld [vmem:[#allocation5 + $0x380] ss:$12 sps:$4 sm:$0xff]  }
  0x77   :  { %1190 = vmatprep.subr.bf16.mxu0 %v1976_v22  ;;  %v2056_v22 = vld [vmem:[#allocation5 + $0x440] ss:$12 sps:$4 sm:$0xff]  }
  0x79   :  { %1736 = vmatpush3.bf16.msra.mxu1 %v1978_v25  ;;  %v2059_v25 = vld [vmem:[#allocation5 + $0x398] ss:$12 sps:$4 sm:$0xff]  }
  0x7a   :  { %1191 = vmatpush1.bf16.msra.mxu0 %v1974_v24  ;;  %1737 = vmatprep.subr.bf16.mxu1 %v1982_v27  ;;  %v2058_v24 = vld [vmem:[#allocation5 + $0x458] ss:$12 sps:$4 sm:$0xff]   ;;  %v2061_v27 = vld [vmem:[#allocation5 + $0x3b0] ss:$12 sps:$4 sm:$0xff]  }
  0x7b   :  { %1192 = vmatprep.subr.bf16.mxu0 %v1981_v26  ;;  %v2060_v26 = vld [vmem:[#allocation5 + $0x470] ss:$12 sps:$4 sm:$0xff]  }
  0x7d   :  { %1738 = vmatpush3.bf16.msra.mxu1 %v1985_v29 }
  0x7e   :  { %1193 = vmatpush1.bf16.msra.mxu0 %v1979_v28  ;;  %1739 = vmatprep.subr.bf16.mxu1 %v1990_v31 }
  0x7f   :  { %1194 = vmatprep.subr.bf16.mxu0 %v1989_v30 }
  0x81   :  { %1740 = vmatpush3.bf16.msra.mxu1 %v1991_v33 }
  0x82   :  { %1195 = vmatpush1.bf16.msra.mxu0 %v1987_v32  ;;  %1741 = vmatprep.subr.bf16.mxu1 %v1995_v35 }
  0x83   :  { %1196 = vmatprep.subr.bf16.mxu0 %v1994_v34 }
  0x85   :  { %1742 = vmatpush3.bf16.msra.mxu1 %v1996_v37 }
  0x86   :  { %1197 = vmatpush1.bf16.msra.mxu0 %v1992_v36  ;;  %1755 = vmatprep.subr.bf16.mxu1 %v2000_v39 }
  0x87   :  { %1198 = vmatprep.subr.bf16.mxu0 %v1999_v38 }
  0x88   :  { %1268 = vmatmul.mubr.bf16.vlgmr.msra.gmra.mrb[8].mxu1 %v2193_v3  ;;  %v2033_v3 = vld [vmem:[#allocation5 + $0x2d8] ss:$12 sps:$4 sm:$0xff]  }
  0x89   :  { %1756 = vmatpush3.bf16.msra.mxu1 %v2001_v42  ;;  %1275 = vmatprep.mubr.bf16.mxu1 %v2197_v10  ;;  %v2043_v10 = vld [vmem:[#allocation5 + $0x3c8] ss:$12 sps:$4 sm:$0xff]  }
  0x8a   :  { %1199 = vmatpush1.bf16.msra.mxu0 %v1997_v40  ;;  %1757 = vmatprep.subr.bf16.mxu1 %v2005_v45 }
  0x8b   :  { %1200 = vmatprep.subr.bf16.mxu0 %v2004_v44 }
  0x8d   :  { %1758 = vmatpush3.bf16.msra.mxu1 %v2006_v47 }
  0x8e   :  { %1201 = vmatpush1.bf16.msra.mxu0 %v2002_v46  ;;  %1759 = vmatprep.subr.bf16.mxu1 %v2010_v49 }
  0x8f   :  { %1202 = vmatprep.subr.bf16.mxu0 %v2009_v48 }
  0x90   :  { %1276 = vmatmul.mubr.bf16.gmra.mrb[12].mxu1 %v2202_v17  ;;  %v2049_v17 = vld [vmem:[#allocation2 + $0x40] ss:$24 sps:$4 sm:$0xff]  }
  0x91   :  { %1760 = vmatpush3.bf16.msra.mxu1 %v2011_v53  ;;  %1316 = vmatprep.mubr.bf16.mxu1 %v2189_v51  ;;  %v2037_v51 = vld [vmem:[#allocation5 + $0x46c] ss:$12 sps:$4 sm:$0xff]  }
  0x92   :  { %1203 = vmatpush1.bf16.msra.mxu0 %v2007_v50  ;;  %1761 = vmatprep.subr.bf16.mxu1 %v2015_v55 }
  0x93   :  { %1204 = vmatprep.subr.bf16.mxu0 %v2014_v54 }
  0x95   :  { %1762 = vmatpush3.bf16.msra.mxu1 %v2016_v57 }
  0x96   :  { %1205 = vmatpush1.bf16.msra.mxu0 %v2012_v56  ;;  %1763 = vmatprep.subr.bf16.mxu1 %v2020_v59 }
  0x97   :  { %1206 = vmatprep.subr.bf16.mxu0 %v2019_v58 }
  0x99   :  { %1764 = vmatpush3.bf16.msra.mxu1 %v2021_v61 }
  0x9a   :  { %1207 = vmatpush1.bf16.msra.mxu0 %v2017_v60  ;;  %1765 = vmatprep.subr.bf16.mxu1 %v2025_v63 }
  0x9b   :  { %1208 = vmatprep.subr.bf16.mxu0 %v2024_v62 }
  0x9d   :  { %1766 = vmatpush3.bf16.msra.mxu1 %v2026_v1 }
  0x9e   :  { %1209 = vmatpush1.bf16.msra.mxu0 %v2022_v0  ;;  %1767 = vmatprep.subr.bf16.mxu1 %v2033_v3 }
  0x9f   :  { %1210 = vmatprep.subr.bf16.mxu0 %v2032_v2 }
  0xa1   :  { %1768 = vmatpush3.bf16.msra.mxu1 %v2034_v6 }
  0xa2   :  { %1211 = vmatpush1.bf16.msra.mxu0 %v2030_v5  ;;  %1769 = vmatprep.subr.bf16.mxu1 %v2038_v7 }
  0xa3   :  { %1212 = vmatprep.subr.bf16.mxu0 %v2037_v51 }
  0xa5   :  { %1770 = vmatpush3.bf16.msra.mxu1 %v2039_v9 }
  0xa6   :  { %1213 = vmatpush1.bf16.msra.mxu0 %v2035_v8  ;;  %1811 = vmatprep.subr.bf16.mxu1 %v2043_v10 }
  0xa7   :  { %1783 = vmatprep.subr.bf16.mxu0 %v2043_v10 }
  0xa8   :  { %1317 = vmatmul.mubr.bf16.vlgmr.msra.gmra.mrb[16].mxu1 %v2195_v4  ;;  %v2053_v4 = vld [vmem:[#allocation5 + $0x350] ss:$12 sps:$4 sm:$0xff]  }
  0xa9   :  { %1215 = vmatmul.mubr.bf16.vlgmr.msra.gmra.mrb[0].mxu0 %v2040_v11  ;;  %1819 = vmatpush3.bf16.msra.mxu1 %v2044_v12 }
  0xaa   :  { %1784 = vmatpush3.bf16.msra.mxu0 %v2044_v12  ;;  %1812 = vmatprep.subr.bf16.mxu1 %v2045_v13 }
  0xab   :  { %1785 = vmatprep.subr.bf16.mxu0 %v2045_v13  ;;  %1224 = vmatprep.mubr.bf16.mxu0 %v2047_v14 }
  0xac   :  { %1324 = vmatprep.mubr.bf16.mxu1 %v2206_v41 }
  0xad   :  { %1820 = vmatpush3.bf16.msra.mxu1 %v2046_v15 }
  0xae   :  { %1786 = vmatpush3.bf16.msra.mxu0 %v2046_v15  ;;  %1813 = vmatprep.subr.bf16.mxu1 %v2050_v16 }
  0xaf   :  { %1787 = vmatprep.subr.bf16.mxu0 %v2050_v16 }
  0xb0   :  { %1325 = vmatmul.mubr.bf16.gmra.mrb[20].mxu1 %v2208_v43 }
  0xb1   :  { %1225 = vmatmul.mubr.bf16.gmra.mrb[4].mxu0 %v2049_v17  ;;  %1821 = vmatpush3.bf16.msra.mxu1 %v2051_v18 }
  0xb2   :  { %1788 = vmatpush3.bf16.msra.mxu0 %v2051_v18  ;;  %1814 = vmatprep.subr.bf16.mxu1 %v2052_v19 }
  0xb3   :  { %1789 = vmatprep.subr.bf16.mxu0 %v2052_v19  ;;  %1365 = vmatprep.mubr.bf16.mxu0 %v2214_v52 }
  0xb4   :  { %1373 = vmatprep.mubr.bf16.mxu1 %v2047_v14 }
  0xb5   :  { %1822 = vmatpush3.bf16.msra.mxu1 %v2053_v4 }
  0xb6   :  { %1790 = vmatpush3.bf16.msra.mxu0 %v2053_v4  ;;  %1815 = vmatprep.subr.bf16.mxu1 %v2054_v20 }
  0xb7   :  { %1791 = vmatprep.subr.bf16.mxu0 %v2054_v20 }
  0xb9   :  { %1823 = vmatpush3.bf16.msra.mxu1 %v2055_v21 }
  0xba   :  { %1792 = vmatpush3.bf16.msra.mxu0 %v2055_v21  ;;  %1816 = vmatprep.subr.bf16.mxu1 %v2056_v22 }
  0xbb   :  { %1793 = vmatprep.subr.bf16.mxu0 %v2056_v22 }
  0xbd   :  { %1824 = vmatpush3.bf16.msra.mxu1 %v2057_v23 }
  0xbe   :  { %1794 = vmatpush3.bf16.msra.mxu0 %v2057_v23  ;;  %1817 = vmatprep.subr.bf16.mxu1 %v2058_v24 }
  0xbf   :  { %1795 = vmatprep.subr.bf16.mxu0 %v2058_v24 }
  0xc1   :  { %1825 = vmatpush3.bf16.msra.mxu1 %v2059_v25 }
  0xc2   :  { %1796 = vmatpush3.bf16.msra.mxu0 %v2059_v25  ;;  %1818 = vmatprep.subr.bf16.mxu1 %v2060_v26 }
  0xc3   :  { %1797 = vmatprep.subr.bf16.mxu0 %v2060_v26 }
  0xc5   :  { %1826 = vmatpush3.bf16.msra.mxu1 %v2061_v27 }
  0xc6   :  { %1798 = vmatpush3.bf16.msra.mxu0 %v2061_v27 }
  0xc8   :  { %1374 = vmatmul.mubr.bf16.vlgmr.msra.gmra.mrb[24].mxu1 %v2049_v17 }
  0xc9   :  { %1366 = vmatmul.mubr.bf16.vlgmr.msra.gmra.mrb[8].mxu0 %v2040_v11 }
 0x13b   :  { %v1110_v28 = vpop.f32.mrb[0].mxu1 }
 0x13c   :  { %v1112_v29 = vpop.f32.mrb[1].mxu1 }
 0x13d   :  { %v1114_v30 = vpop.f32.mrb[2].mxu1 }
 0x13e   :  { %v1116_v31 = vpop.f32.mrb[3].mxu1 }
 0x143   :  { %v1120_v32 = vpop.f32.mrb[4].mxu1 }
 0x144   :  { %v1122_v33 = vpop.f32.mrb[5].mxu1 }
 0x145   :  { %v1124_v34 = vpop.f32.mrb[6].mxu1 }
 0x146   :  { %v1126_v35 = vpop.f32.mrb[7].mxu1 }
 0x15b   :  { %v1743_v36 = vpop.f32.mrb[8].mxu1 }
 0x15c   :  { %v1744_v37 = vpop.f32.mrb[9].mxu1 }
 0x15d   :  { %v1745_v38 = vadd.f32 %v1744_v37, %v1743_v36  ;;  %v1746_v39 = vpop.f32.mrb[10].mxu1 }
 0x15e   :  { %v1747_v40 = vpop.f32.mrb[11].mxu1 }
 0x15f   :  { %v1748_v41 = vadd.f32 %v1747_v40, %v1746_v39 }
 0x163   :  { %v1749_v42 = vpop.f32.mrb[12].mxu1 }
 0x164   :  { %v1750_v43 = vpop.f32.mrb[13].mxu1 }
 0x165   :  { %v1751_v44 = vadd.f32 %v1750_v43, %v1749_v42  ;;  %v1752_v45 = vpop.f32.mrb[14].mxu1 }
 0x166   :  { %v1753_v46 = vpop.f32.mrb[15].mxu1 }
 0x167   :  { %v1754_v47 = vadd.f32 %v1753_v46, %v1752_v45 }
 0x17b   :  { %v1771_v49 = vpop.f32.mrb[16].mxu1 }
 0x17c   :  { %v1216_v48 = vpop.f32.mrb[0].mxu0  ;;  %v1772_v53 = vpop.f32.mrb[17].mxu1 }
 0x17d   :  { %v2223_v50 = vadd.f32 %v1216_v48, %v1110_v28  ;;  %v1218_v52 = vpop.f32.mrb[1].mxu0  ;;  %v1773_v55 = vadd.f32 %v1772_v53, %v1771_v49  ;;  %v1774_v57 = vpop.f32.mrb[18].mxu1 }
 0x17e   :  { %v2225_v54 = vadd.f32 %v1218_v52, %v1112_v29  ;;  %v1220_v56 = vpop.f32.mrb[2].mxu0  ;;  %v1775_v60 = vpop.f32.mrb[19].mxu1 }
 0x17f   :  { %v2227_v58 = vadd.f32 %v1220_v56, %v1114_v30  ;;  %v1222_v59 = vpop.f32.mrb[3].mxu0  ;;  %v1319_v61 = vadd.f32 %v1773_v55, %v1745_v38  ;;  %v1776_v63 = vadd.f32 %v1775_v60, %v1774_v57  ;;  %v1383_v0 = vsel %vm1382_vm0, %v2223_v50, -inf }
 0x180   :  { %v2229_v62 = vadd.f32 %v1222_v59, %v1116_v31 }
 0x181   :  { %v1384_v1 = vsel %vm1382_vm0, %v2227_v58, -inf  ;;  %v1322_v3 = vadd.f32 %v1776_v63, %v1748_v41 }
 0x182   :  { %v1385_v2 = vmax.f32 %v1383_v0, %v1384_v1 }
 0x183   :  { %v1777_v51 = vpop.f32.mrb[20].mxu1 }
 0x184   :  { %v1386_v5 = vrot.slane %v1385_v2, 4  ;;  %v1226_v6 = vpop.f32.mrb[4].mxu0  ;;  %v1778_v9 = vpop.f32.mrb[21].mxu1 }
 0x185   :  { %v2235_v7 = vadd.f32 %v1226_v6, %v1120_v32  ;;  %v1228_v8 = vpop.f32.mrb[5].mxu0  ;;  %v1779_v12 = vadd.f32 %v1778_v9, %v1777_v51  ;;  %v1780_v14 = vpop.f32.mrb[22].mxu1  ;;  %v1406_v6 = vrot.slane %v2225_v54, 1 }
 0x186   :  { %v1387_v10 = vmax.f32 %v1385_v2, %v1386_v5  ;;  %v2237_v11 = vadd.f32 %v1228_v8, %v1122_v33  ;;  %v1230_v13 = vpop.f32.mrb[6].mxu0  ;;  %v1781_v17 = vpop.f32.mrb[23].mxu1 }
 0x187   :  { %v2239_v15 = vadd.f32 %v1230_v13, %v1124_v34  ;;  %v1232_v16 = vpop.f32.mrb[7].mxu0  ;;  %v1327_v18 = vadd.f32 %v1779_v12, %v1751_v44  ;;  %v1392_v4 = vsel %vm1382_vm0, %v2235_v7, -inf  ;;  %v1782_v21 = vadd.f32 %v1781_v17, %v1780_v14 }
 0x188   :  { %v2241_v19 = vadd.f32 %v1232_v16, %v1126_v35  ;;  %v1388_v22 = vrot.slane %v1387_v10, 2  ;;  %v1409_v9 = vrot.slane %v2237_v11, 1 }
 0x189   :  { %v1393_v20 = vsel %vm1382_vm0, %v2239_v15, -inf  ;;  %v1330_v24 = vadd.f32 %v1782_v21, %v1754_v47 }
 0x18a   :  { %v1394_v23 = vmax.f32 %v1392_v4, %v1393_v20  ;;  %v1389_v26 = vmax.f32 %v1387_v10, %v1388_v22  ;;  %v1410_v51 = vrot.slane %v2241_v19, 1 }
 0x18c   :  { %v1395_v25 = vrot.slane %v1394_v23, 4  ;;  %v1390_v29 = vrot.slane %v1389_v26, 1  ;;  %v1411_v10 = vsel %vm1405_vm3, %v1409_v9, %v1410_v51 }
 0x18e   :  { %v1396_v27 = vmax.f32 %v1394_v23, %v1395_v25  ;;  %v1391_v32 = vmax.f32 %v1389_v26, %v1390_v29 }
 0x190   :  { %v1397_v28 = vrot.slane %v1396_v27, 2 }
 0x192   :  { %v1398_v30 = vmax.f32 %v1396_v27, %v1397_v28 }
 0x194   :  { %v1399_v31 = vrot.slane %v1398_v30, 1 }
 0x196   :  { %v1400_v33 = vmax.f32 %v1398_v30, %v1399_v31 }
 0x198   :  { %v2248_v34 = vsel %vm1510_vm1, %v1400_v33, %v1391_v32 }
 0x19b   :  { %v1805_v36 = vpop.f32.mrb[24].mxu1 }
 0x19c   :  { %v1799_v35 = vpop.f32.mrb[8].mxu0  ;;  %v1806_v38 = vpop.f32.mrb[25].mxu1 }
 0x19d   :  { %v1800_v37 = vpop.f32.mrb[9].mxu0  ;;  %v1807_v40 = vadd.f32 %v1806_v38, %v1805_v36  ;;  %v1808_v42 = vpop.f32.mrb[26].mxu1 }
 0x19e   :  { %v1801_v39 = vadd.f32 %v1800_v37, %v1799_v35  ;;  %v1802_v41 = vpop.f32.mrb[10].mxu0  ;;  %v1809_v44 = vpop.f32.mrb[27].mxu1 }
 0x19f   :  { %v1803_v43 = vpop.f32.mrb[11].mxu0  ;;  %v1376_v46 = vadd.f32 %v1807_v40, %v1327_v18  ;;  %v1810_v48 = vadd.f32 %v1809_v44, %v1808_v42 }
 0x1a0   :  { %v1368_v45 = vadd.f32 %v1801_v39, %v1319_v61  ;;  %v1804_v47 = vadd.f32 %v1803_v43, %v1802_v41 }
 0x1a1   :  { %v1379_v52 = vadd.f32 %v1810_v48, %v1330_v24  ;;  %v1455_v56 = vrot.slane %v1376_v46, 1  ;;  %v1478_v57 = vrot.slane %v1376_v46, 2 }
 0x1a2   :  { %v1371_v49 = vadd.f32 %v1804_v47, %v1322_v3  ;;  %v1452_v53 = vrot.slane %v1368_v45, 1  ;;  %v1475_v55 = vrot.slane %v1368_v45, 2  ;;  %v1407_v3 = vrot.slane %v2229_v62, 1 }
 0x1a3   :  { %v1456_v63 = vrot.slane %v1379_v52, 1  ;;  %v1479_v0 = vrot.slane %v1379_v52, 2 }
 0x1a4   :  { %v1453_v59 = vrot.slane %v1371_v49, 1  ;;  %v1476_v60 = vrot.slane %v1371_v49, 2  ;;  %v1408_v8 = vsel %vm1405_vm3, %v1406_v6, %v1407_v3 }
 0x1a5   :  { %v1457_v1 = vsel %vm1405_vm3, %v1455_v56, %v1456_v63  ;;  %v1480_v61 = vsel %vm1474_vm2, %v1478_v57, %v1479_v0 }
 0x1a6   :  { %v1454_v2 = vsel %vm1405_vm3, %v1452_v53, %v1453_v59  ;;  %v1477_v5 = vsel %vm1474_vm2, %v1475_v55, %v1476_v60  ;;  %1462 = vrot.lane.b32.xlu1 %v1457_v1, %s2140_s1 }
 0x1a7   :  { %1458 = vrot.lane.b32.xlu0 %v1454_v2, %s2140_s1 }
 0x1aa   :  { %1464 = vrot.lane.b32.xlu1 %v1456_v63, %s2140_s1 }
 0x1ab   :  { %1460 = vrot.lane.b32.xlu0 %v1453_v59, %s2140_s1 }
 0x1ae   :  { %1414 = vrot.lane.b32.xlu1 %v1407_v3, %s2140_s1 }
 0x1af   :  { %1412 = vrot.lane.b32.xlu0 %v1408_v8, %s2140_s1 }
 0x1b2   :  { %1418 = vrot.lane.b32.xlu1 %v1410_v51, %s2140_s1  ;;  %v1526_v51 = vlaneseq }
 0x1b3   :  { %1416 = vrot.lane.b32.xlu0 %v1411_v10, %s2140_s1  ;;  %v1524_v10 = vld [vmem:[%s2302_s2] sm:$0x3]  ;;  %s2106_s2 = scalar_lea.vmem %s1562_s15, 64 }
 0x1b4   :  { %v1527_v8 = vshrl.u32 %v1526_v51, 7  ;;  %p2107_p2 = scmp.ne.s32.totalorder %s1562_s15, %s2106_s2  ;;  %p2112_p4 = scmp.lt.s32.totalorder %s2106_s2, %s2106_s2 }
 0x1b6   :  { %v1528_v9 = vsub.s32 0, %v1527_v8  ;;  %p2113_p5 = por %p2112_p4, %p2111_p3 }
 0x1b8   :  { %p2114_p6 = pnand %p2113_p5, %p2107_p2 }
 0x218   :  { %v1463_v12 = vpop.permute.xlu1 %1462 }
 0x219   :  { %v1459_v13 = vpop.permute.xlu0 %1458  ;;  %v1472_v14 = vadd.f32 %v2237_v11, %v1463_v12  ;;  %v1532_v12 = vsub.s32 1, %v1527_v8 }
 0x21a   :  { %v1470_v16 = vadd.f32 %v2225_v54, %v1459_v13  ;;  %v2141_v13 = vmov 1983009808  }
 0x21b   :  { %v1487_v17 = vadd.f32 %v1480_v61, %v1472_v14  ;;  %v1544_v14 = vunpack.c.l.s4 %v2141_v13 }
 0x21c   :  { %v1485_v18 = vadd.f32 %v1477_v5, %v1470_v16  ;;  %v1465_v4 = vpop.permute.xlu1 %1464  ;;  %v1529_v16 = vrot.slane %v1524_v10, %v1528_v9 }
 0x21d   :  { %v1461_v20 = vpop.permute.xlu0 %1460  ;;  %v1473_v21 = vadd.f32 %v2241_v19, %v1465_v4  ;;  %v1499_v25 = vsel %vm1428_vm4, %v1487_v17, -inf  ;;  %v1533_v17 = vrot.slane %v1524_v10, %v1532_v12 }
 0x21e   :  { %v1471_v22 = vadd.f32 %v2229_v62, %v1461_v20  ;;  %v1489_v26 = vsel %vm1428_vm4, %v1485_v18, -inf  ;;  %v1545_v18 = vunpack.c.0.s8 %v1544_v14 }
 0x21f   :  { %v1488_v23 = vadd.f32 %v1479_v0, %v1473_v21 }
 0x220   :  { %v1486_v24 = vadd.f32 %v1476_v60, %v1471_v22  ;;  %v1415_v11 = vpop.permute.xlu1 %1414  ;;  %v1548_v22 = vsub.s32 %v1545_v18, %v1527_v8 }
 0x221   :  { %v1413_v27 = vpop.permute.xlu0 %1412  ;;  %v1500_v54 = vsel %vm1490_vm5, %v1488_v23, -inf  ;;  %v1425_v29 = vadd.f32 %v2227_v58, %v1415_v11 }
 0x222   :  { %v1491_v28 = vsel %vm1490_vm5, %v1486_v24, -inf  ;;  %v1424_v30 = vadd.f32 %v2223_v50, %v1413_v27  ;;  %v1501_v31 = vmax.f32 %v1499_v25, %v1500_v54 }
 0x223   :  { %v1492_v19 = vmax.f32 %v1489_v26, %v1491_v28  ;;  %v1431_v62 = vsel %vm1430_vm6, %v1425_v29, -inf }
 0x224   :  { %v1429_v32 = vsel %vm1428_vm4, %v1424_v30, -inf  ;;  %v1502_v33 = vrot.slane %v1501_v31, 4  ;;  %v1419_v37 = vpop.permute.xlu1 %1418 }
 0x225   :  { %v1493_v35 = vrot.slane %v1492_v19, 4  ;;  %v1432_v36 = vmax.f32 %v1429_v32, %v1431_v62  ;;  %v1417_v38 = vpop.permute.xlu0 %1416  ;;  %v1427_v39 = vadd.f32 %v2239_v15, %v1419_v37 }
 0x226   :  { %v1426_v40 = vadd.f32 %v2235_v7, %v1417_v38  ;;  %v1503_v41 = vmax.f32 %v1501_v31, %v1502_v33 }
 0x227   :  { %v1494_v42 = vmax.f32 %v1492_v19, %v1493_v35  ;;  %v1433_v58 = vrot.slane %v1432_v36, 4  ;;  %v1440_v50 = vsel %vm1430_vm6, %v1427_v39, -inf }
 0x228   :  { %v1439_v43 = vsel %vm1428_vm4, %v1426_v40, -inf  ;;  %v1504_v44 = vrot.slane %v1503_v41, 2 }
 0x229   :  { %v1495_v45 = vrot.slane %v1494_v42, 2  ;;  %v1434_v46 = vmax.f32 %v1432_v36, %v1433_v58  ;;  %v1441_v47 = vmax.f32 %v1439_v43, %v1440_v50 }
 0x22a   :  { %v1505_v53 = vmax.f32 %v1503_v41, %v1504_v44 }
 0x22b   :  { %v1435_v48 = vrot.slane %v1434_v46, 2  ;;  %v1442_v49 = vrot.slane %v1441_v47, 4  ;;  %v1496_v52 = vmax.f32 %v1494_v42, %v1495_v45 }
 0x22c   :  { %v1506_v57 = vrot.slane %v1505_v53, 1 }
 0x22d   :  { %v1436_v55 = vmax.f32 %v1434_v46, %v1435_v48  ;;  %v1443_v56 = vmax.f32 %v1441_v47, %v1442_v49  ;;  %v1497_v15 = vrot.slane %v1496_v52, 1 }
 0x22e   :  { %v1507_v60 = vmax.f32 %v1505_v53, %v1506_v57 }
 0x22f   :  { %v1444_v7 = vrot.slane %v1443_v56, 2  ;;  %v1498_v59 = vmax.f32 %v1496_v52, %v1497_v15  ;;  %v1437_v63 = vrot.slane %v1436_v55, 1 }
 0x231   :  { %v1445_v0 = vmax.f32 %v1443_v56, %v1444_v7  ;;  %v1519_v1 = vsel %vm1510_vm1, %v1507_v60, %v1498_v59  ;;  %v1438_v61 = vmax.f32 %v1436_v55, %v1437_v63 }
 0x232   :  { %1520 = vrot.lane.b32.xlu0 %v1519_v1, %s2140_s1 }
 0x233   :  { %v1446_v2 = vrot.slane %v1445_v0, 1 }
 0x235   :  { %v1447_v5 = vmax.f32 %v1445_v0, %v1446_v2 }
 0x237   :  { %v1515_v3 = vsel %vm1510_vm1, %v1447_v5, %v1438_v61 }
 0x238   :  { %v1523_v6 = vsel %vm1382_vm0, %v2248_v34, %v1515_v3 }
 0x239   :  { %v1536_v4 = vadd.f32 %v1529_v16, %v1523_v6 }
 0x23b   :  { %v1538_v23 = vmax.f32 %v1536_v4, 0.0 }
 0x2a4   :  { %v1521_v20 = vpop.permute.xlu0 %1520 }
 0x2a5   :  { %v1537_v21 = vadd.f32 %v1533_v17, %v1521_v20 }
 0x2a7   :  { %v1539_v24 = vmax.f32 %v1537_v21, 0.0 }
 0x2a9   :  { %v1542_v34 = vcombine.low %v1538_v23, %v1539_v24 }
 0x2ab   :  { %v1549_v25 = vrot.slane %v1542_v34, %v1548_v22 }
 0x2ad   :  { %1554 = vst.msk [vmem:[#allocation7] sm:$0xf] %vm1553_vm9, %v1549_v25 }
 0x2ae   :  { %2117 = shalt.err (!%p2114_p6)
}
 0x2af   :  { %s2118_s18 = scalar_lea.hbm %s2303_s3, 64 }
 0x2b0   :  { %p2119_p7 = scmp.ne.s32.totalorder %s2303_s3, %s2118_s18  ;;  %p2122_p8 = scmp.lt.u32.totalorder %s2118_s18, %s2303_s3 }
 0x2b2   :  { %p2124_p9 = pnand %p2122_p8, %p2119_p7 }
 0x2b4   :  { %2127 = shalt.err (!%p2124_p9)
}
 0x2b5   :  { %1564 = dma.vmem_to_hbm [thread:$0]  %s1562_s15, 64, %s2303_s3, [#allocation4]  }
 0x2b6   :  { %2132 = dma.done.wait [#allocation4], 64  }
 0x2b7   :  { %2133 = vsyncadd [#allocation4], 4294967232 }
 0x2b8   :  { %1568 = vsyncpa [#allocation3], 1 }
 0x2b9   :  { %1569 = vsyncpa [#allocation6], 1 }
 0x2ba   :  { %1570 = vsyncpa [#allocation4], 1 }

</bundles_post_ra>
